<compile_context>
chip_gen: v7x
topology: tpu7x:2x2x1
jax: 0.10.0
libtpu: 0.0.40
codegen_flags: <defaults>
</compile_context>

<pallas_src>
import functools

import jax
import jax.numpy as jnp
from jax import lax
from jax.experimental import pallas as pl
from jax.experimental.pallas import tpu as pltpu


def _round_up(x, m):
    return ((x + m - 1) // m) * m


def _sublane_align(dtype):
    """Minimum second-minor tile multiple for a dtype (8 for f32, 16 for bf16,
    32 for int8/fp8) so vregs are fully packed."""
    return max(8, 32 // jnp.dtype(dtype).itemsize)


def _choose_tile(dim, target, align):
    """Pick (tile, padded_dim): tile % align == 0, padded_dim % tile == 0.

    If the hardware-min-padded dim fits in a single tile <= target, use exactly
    that (pad only to the hardware minimum).  Otherwise take the largest tile
    <= target whose padding waste is <= ~6%, falling back to the least-padding
    choice.
    """
    target = max(align, (target // align) * align)
    dmin = _round_up(dim, align)
    if dmin <= target:
        return dmin, dmin
    best_t, best_p = None, None
    t = target
    while t >= align:
        padded = _round_up(dim, t)
        if best_p is None or padded < best_p:
            best_t, best_p = t, padded
        if 16 * (padded - dim) <= padded:  # <= 6.25% waste: accept largest such tile
            return t, padded
        t -= align
    return best_t, best_p


def _grad_linear_kernel(x_ref, w_ref, b_ref, o_ref, acc_ref):
    """One (tm, tn) output tile; K is the innermost ("arbitrary") grid axis.

    x_ref: (tm, tk)   w_ref: (tn, tk)   b_ref: (1, tn) f32   o_ref: (tm, tn)
    acc_ref: (tm, tn) f32 scratch, resident across the K axis.
    """
    k = pl.program_id(2)

    @pl.when(k == 0)
    def _():
        # Seed the accumulator with the broadcast bias (saves an epilogue add).
        acc_ref[...] = jnp.broadcast_to(b_ref[...], acc_ref.shape).astype(jnp.float32)

    # x @ W^T: contract the last dim of both operands on the MXU, so W can
    # stay in the PyTorch [N, K] layout with no wrapper-side transpose.
    acc_ref[...] += lax.dot_general(
        x_ref[...],
        w_ref[...],
        dimension_numbers=(((1,), (1,)), ((), ())),
        preferred_element_type=jnp.float32,
    )

    @pl.when(k == pl.num_programs(2) - 1)
    def _():
        o_ref[...] = acc_ref[...].astype(o_ref.dtype)


def _prepare_weights(weights, bias, *, tn, tk, compute_dtype):
    """Cast/pad W [N, K] and bias [N] once (hoisted out of the per-call path)."""
    N, K = weights.shape
    tn_, Np = _choose_tile(N, tn, 128)
    tk_, Kp = _choose_tile(K, tk, 128)
    w = weights if compute_dtype is None else weights.astype(compute_dtype)
    if (Np, Kp) != (N, K):
        w = jnp.pad(w, ((0, Np - N), (0, Kp - K)))
    b2 = bias.astype(jnp.float32).reshape(1, N)
    if Np != N:
        b2 = jnp.pad(b2, ((0, 0), (0, Np - N)))
    return w, b2, tn_, tk_


@functools.partial(
    jax.jit, static_argnames=("n_out", "tm", "tn", "tk", "compute_dtype")
)
def _grad_linear_prepared(x, w_pad, b_pad, *, n_out, tm, tn, tk, compute_dtype):
    """Pallas call on pre-prepared (cast/padded) weights and bias."""
    out_dtype = x.dtype
    *lead, K = x.shape
    x2 = x.reshape(-1, K)
    M = x2.shape[0]
    Np, Kp = w_pad.shape
    assert K <= Kp and n_out <= Np and Np % tn == 0 and Kp % tk == 0

    c_dtype = out_dtype if compute_dtype is None else compute_dtype
    align_m = _sublane_align(c_dtype)
    tm, Mp = _choose_tile(M, tm, align_m)

    # v7x has 2 TensorCores that shard "parallel" grid axes; make sure the
    # parallel extent is >= 2 whenever a dimension splits cleanly.
    if (Mp // tm) * (Np // tn) == 1:
        if Np % 256 == 0:
            tn = Np // 2
        elif Mp % (2 * align_m) == 0:
            tm = Mp // 2

    if compute_dtype is not None:
        x2 = x2.astype(compute_dtype)
    if (Mp, Kp) != (M, K):
        x2 = jnp.pad(x2, ((0, Mp - M), (0, Kp - K)))

    grid = (Mp // tm, Np // tn, Kp // tk)
    c_isize = jnp.dtype(c_dtype).itemsize
    o_isize = jnp.dtype(out_dtype).itemsize

    # Double-buffered x / W / bias / out blocks + the f32 accumulator; keep the
    # scoped-VMEM request under v7x's 64 MiB physical VMEM.
    vmem_bytes = (
        2 * tm * tk * c_isize
        + 2 * tn * tk * c_isize
        + 2 * tn * 4
        + 2 * tm * tn * o_isize
        + tm * tn * 4
    )
    vmem_limit = min(64 << 20, max(32 << 20, vmem_bytes + (4 << 20)))

    cost = pl.CostEstimate(
        flops=2 * Mp * Np * Kp,
        transcendentals=0,
        bytes_accessed=(
            Mp * Kp * c_isize * (Np // tn)    # x streamed once per N tile
            + Np * Kp * c_isize * (Mp // tm)  # W streamed once per M tile
            + Np * 4 * (Mp // tm)             # bias
            + Mp * Np * o_isize               # output
        ),
    )

    out_padded = pl.pallas_call(
        _grad_linear_kernel,
        out_shape=jax.ShapeDtypeStruct((Mp, Np), out_dtype),
        grid_spec=pltpu.PrefetchScalarGridSpec(
            num_scalar_prefetch=0,
            grid=grid,
            in_specs=[
                pl.BlockSpec((tm, tk), lambda i, j, k: (i, k)),  # x tile
                pl.BlockSpec((tn, tk), lambda i, j, k: (j, k)),  # W tile ([N, K])
                pl.BlockSpec((1, tn), lambda i, j, k: (0, j)),   # bias tile
            ],
            out_specs=pl.BlockSpec((tm, tn), lambda i, j, k: (i, j)),
            scratch_shapes=[pltpu.VMEM((tm, tn), jnp.float32)],
        ),
        compiler_params=pltpu.CompilerParams(
            dimension_semantics=("parallel", "parallel", "arbitrary"),
            vmem_limit_bytes=vmem_limit,
        ),
        cost_estimate=cost,
    )(x2, w_pad, b_pad)

    out = out_padded[:M, :n_out]
    return out.reshape(*lead, n_out)


def grad_linear(x, weights, bias, *, tm=512, tn=512, tk=1024,
                compute_dtype=jnp.bfloat16):
    """y = x @ weights^T + bias (torch.nn.functional.linear).

    x: [..., in_features], weights: [out_features, in_features] (nn.Linear
    layout), bias: [out_features].  Convenience wrapper that prepares the
    weights per call; for repeated application with the same parameters (the
    MAML inner loop) use the GradLinear class, which hoists the weight prep.
    """
    w_pad, b_pad, tn_, tk_ = _prepare_weights(
        weights, bias, tn=tn, tk=tk, compute_dtype=compute_dtype)
    return _grad_linear_prepared(
        x, w_pad, b_pad, n_out=weights.shape[0],
        tm=tm, tn=tn_, tk=tk_, compute_dtype=compute_dtype)


class GradLinear:
    """JAX/Pallas analogue of the PyTorch GradLinear module (forward only).

    Weight cast/pad is done once at construction, not per forward call.
    """

    def __init__(self, weights, bias, *, tm=512, tn=512, tk=1024,
                 compute_dtype=jnp.bfloat16):
        self.weights = weights
        self.bias = bias
        self._n_out = weights.shape[0]
        self._tm = tm
        self._compute_dtype = compute_dtype
        self._w_pad, self._b_pad, self._tn, self._tk = _prepare_weights(
            weights, bias, tn=tn, tk=tk, compute_dtype=compute_dtype)

    def __call__(self, x):
        return _grad_linear_prepared(
            x, self._w_pad, self._b_pad, n_out=self._n_out,
            tm=self._tm, tn=self._tn, tk=self._tk,
            compute_dtype=self._compute_dtype)


if __name__ == "__main__":
    key = jax.random.PRNGKey(0)

    # --- Small shapes consistent with GradLinear(in_features=32, out_features=64)
    batch, in_features, out_features = 8, 32, 64
    kx, kw, kb = jax.random.split(key, 3)
    bound = 1.0 / (in_features ** 0.5)  # nn.Linear init: U(-1/sqrt(in), 1/sqrt(in))
    weights = jax.random.uniform(
        kw, (out_features, in_features), jnp.float32, -bound, bound)
    bias = jax.random.uniform(kb, (out_features,), jnp.float32, -bound, bound)
    x = jax.random.normal(kx, (batch, in_features), jnp.float32)

    y_ref = x @ weights.T + bias

    # Default bf16-MXU path (f32 accumulation): loose check vs f32 reference.
    y = jax.block_until_ready(grad_linear(x, weights, bias))
    assert y.shape == (batch, out_features) and y.dtype == x.dtype
    assert jnp.allclose(y, y_ref, atol=1e-1, rtol=1e-1), "bf16 path mismatch (small)"

    # Exact f32 opt-in path.
    y32 = jax.block_until_ready(grad_linear(x, weights, bias, compute_dtype=jnp.float32))
    assert jnp.allclose(y32, y_ref, atol=1e-4, rtol=1e-4), "f32 path mismatch (small)"

    # Module-style wrapper with hoisted weight prep must match the functional path.
    layer = GradLinear(weights, bias)
    ym = jax.block_until_ready(layer(x))
    assert jnp.allclose(ym, y, atol=0.0, rtol=0.0), "hoisted-prep path mismatch"

    # --- Larger, ragged shapes: exercises multi-tile M, hardware-minimum N/K
    #     padding and the multi-core parallel split.
    M2, K2, N2 = 512, 384, 320
    k2x, k2w, k2b = jax.random.split(jax.random.PRNGKey(1), 3)
    bound2 = 1.0 / (K2 ** 0.5)
    w2 = jax.random.uniform(k2w, (N2, K2), jnp.float32, -bound2, bound2)
    b2 = jax.random.uniform(k2b, (N2,), jnp.float32, -bound2, bound2)
    x2 = jax.random.normal(k2x, (M2, K2), jnp.float32)
    y2_ref = x2 @ w2.T + b2

    y2_32 = jax.block_until_ready(grad_linear(x2, w2, b2, compute_dtype=jnp.float32))
    assert y2_32.shape == (M2, N2)
    assert jnp.allclose(y2_32, y2_ref, atol=5e-4, rtol=5e-4), "f32 path mismatch (large)"

    y2_bf = jax.block_until_ready(grad_linear(x2, w2, b2))
    assert jnp.allclose(y2_bf, y2_ref, atol=1e-1, rtol=1e-1), "bf16 path mismatch (large)"

    print("KERNEL_OK")
</pallas_src>

<mosaic_0001>
module attributes {stable_mosaic.version = 11 : i64} {
  func.func @_grad_linear_kernel(%arg0: i32, %arg1: i32, %arg2: i32, %arg3: memref<16x128xbf16, #tpu.memory_space<vmem>>, %arg4: memref<128x128xbf16, #tpu.memory_space<vmem>>, %arg5: memref<1x128xf32, #tpu.memory_space<vmem>>, %arg6: memref<16x128xf32, #tpu.memory_space<vmem>>, %arg7: memref<16x128xf32, #tpu.memory_space<vmem>>) attributes {dimension_semantics = [#tpu.dimension_semantics<parallel>, #tpu.dimension_semantics<parallel>, #tpu.dimension_semantics<arbitrary>], iteration_bounds = array<i64: 1, 1, 1>, scalar_prefetch = 0 : i64, scratch_operands = 1 : i64, tpu.core_type = #tpu.core_type<tc>, window_params = [{transform_indices = @transform_0, window_bounds = array<i64: 16, 128>}, {transform_indices = @transform_1, window_bounds = array<i64: 128, 128>}, {transform_indices = @transform_2, window_bounds = array<i64: 1, 128>}, {transform_indices = @transform_3, window_bounds = array<i64: 16, 128>}]} {
    %c0_i32 = arith.constant 0 : i32
    %0 = arith.cmpi eq, %arg2, %c0_i32 : i32
    %1 = arith.extui %0 : i1 to i32
    %c0_i32_0 = arith.constant 0 : i32
    %2 = arith.cmpi ne, %1, %c0_i32_0 : i32
    scf.if %2 {
      %c0_10 = arith.constant 0 : index
      %c0_11 = arith.constant 0 : index
      %12 = vector.load %arg5[%c0_10, %c0_11] : memref<1x128xf32, #tpu.memory_space<vmem>>, vector<1x128xf32>
      %13 = vector.shape_cast %12 : vector<1x128xf32> to vector<1x128xf32>
      %14 = vector.broadcast %13 : vector<1x128xf32> to vector<16x128xf32>
      %c0_12 = arith.constant 0 : index
      %c0_13 = arith.constant 0 : index
      %15 = vector.load %arg7[%c0_12, %c0_13] : memref<16x128xf32, #tpu.memory_space<vmem>>, vector<16x128xf32>
      tpu.vector_store %arg7[%c0_12, %c0_13], %14 {strides = array<i32>} : memref<16x128xf32, #tpu.memory_space<vmem>>, vector<16x128xf32>,
    } else {
    }
    %c0 = arith.constant 0 : index
    %c0_1 = arith.constant 0 : index
    %3 = vector.load %arg7[%c0, %c0_1] : memref<16x128xf32, #tpu.memory_space<vmem>>, vector<16x128xf32>
    %c0_2 = arith.constant 0 : index
    %c0_3 = arith.constant 0 : index
    %4 = vector.load %arg3[%c0_2, %c0_3] : memref<16x128xbf16, #tpu.memory_space<vmem>>, vector<16x128xbf16>
    %c0_4 = arith.constant 0 : index
    %c0_5 = arith.constant 0 : index
    %5 = vector.load %arg4[%c0_4, %c0_5] : memref<128x128xbf16, #tpu.memory_space<vmem>>, vector<128x128xbf16>
    %cst = arith.constant dense<0.000000e+00> : vector<16x128xf32>
    %6 = tpu.matmul %4, %5, %cst {dimension_numbers = #tpu.dot_dimension_numbers<[1], [1], [0], [0], [0, 0, 1, 0], [], []>} : vector<16x128xbf16>, vector<128x128xbf16>, vector<16x128xf32> -> vector<16x128xf32>
    %7 = arith.addf %3, %6 : vector<16x128xf32>
    %c0_6 = arith.constant 0 : index
    %c0_7 = arith.constant 0 : index
    %8 = vector.load %arg7[%c0_6, %c0_7] : memref<16x128xf32, #tpu.memory_space<vmem>>, vector<16x128xf32>
    tpu.vector_store %arg7[%c0_6, %c0_7], %7 {strides = array<i32>} : memref<16x128xf32, #tpu.memory_space<vmem>>, vector<16x128xf32>,
    %c0_i32_8 = arith.constant 0 : i32
    %9 = arith.cmpi eq, %arg2, %c0_i32_8 : i32
    %10 = arith.extui %9 : i1 to i32
    %c0_i32_9 = arith.constant 0 : i32
    %11 = arith.cmpi ne, %10, %c0_i32_9 : i32
    scf.if %11 {
      %c0_10 = arith.constant 0 : index
      %c0_11 = arith.constant 0 : index
      %12 = vector.load %arg7[%c0_10, %c0_11] : memref<16x128xf32, #tpu.memory_space<vmem>>, vector<16x128xf32>
      %c0_12 = arith.constant 0 : index
      %c0_13 = arith.constant 0 : index
      %13 = vector.load %arg6[%c0_12, %c0_13] : memref<16x128xf32, #tpu.memory_space<vmem>>, vector<16x128xf32>
      tpu.vector_store %arg6[%c0_12, %c0_13], %12 {strides = array<i32>} : memref<16x128xf32, #tpu.memory_space<vmem>>, vector<16x128xf32>,
    } else {
    }
    return
  }
  func.func @transform_0(%arg0: i32, %arg1: i32, %arg2: i32) -> (i32, i32) {
    %c0_i32 = arith.constant 0 : i32
    return %arg0, %arg2 : i32, i32
  }
  func.func @transform_1(%arg0: i32, %arg1: i32, %arg2: i32) -> (i32, i32) {
    %c0_i32 = arith.constant 0 : i32
    return %arg1, %arg2 : i32, i32
  }
  func.func @transform_2(%arg0: i32, %arg1: i32, %arg2: i32) -> (i32, i32) {
    %c0_i32 = arith.constant 0 : i32
    %c0_i32_0 = arith.constant 0 : i32
    return %c0_i32, %arg1 : i32, i32
  }
  func.func @transform_3(%arg0: i32, %arg1: i32, %arg2: i32) -> (i32, i32) {
    %c0_i32 = arith.constant 0 : i32
    return %arg0, %arg1 : i32, i32
  }
}

</mosaic_0001>

<bundles_post_ra>
// kernel: _grad_linear_prepared.1
= control target key start
LH: loop header
LB: loop body
LE: loop exit
PB: predicated region body
PF: predicated region fallthrough
CT: control target
= control target key end

     0   :  { %8 = vsyncpa [#allocation4], 0  ;;  %s250_s12 = smov [#allocation3]   ;;  %s299_s0 = inlined_call_operand.vmem [shape: bf16[16,128], index: 0, kind: input, shape index: {}]   ;;  %s300_s1 = inlined_call_operand.hbm [shape: bf16[128,128], index: 1, kind: input, shape index: {}]   ;;  %s301_s2 = inlined_call_operand.vmem [shape: f32[1,128], index: 2, kind: input, shape index: {}]   ;;  %s302_s3 = inlined_call_operand.vmem [shape: f32[16,128], index: 3, kind: output, shape index: {}]  }
   0x1   :  { %s16_s13 = sshll.u32 %s250_s12, 4  ;;  %s226_s16 = scalar_lea.hbm %s300_s1, 1024  ;;  %s17_s13 = int_to_ptr.vmem [resolvable:$true] %s16_s13 }
   0x2   :  { %p227_p0 = scmp.ne.s32.totalorder %s300_s1, %s226_s16  ;;  %p230_p1 = scmp.lt.u32.totalorder %s226_s16, %s300_s1 }
   0x4   :  { %p232_p2 = pnand %p230_p1, %p227_p0 }
   0x6   :  { %235 = shalt.err (!%p232_p2)
}
   0x7   :  { %s236_s21 = scalar_lea.vmem %s17_s13, 1024  ;;  %p241_p4 = scmp.lt.s32.totalorder %s17_s13, %s17_s13 }
   0x8   :  { %p237_p3 = scmp.ne.s32.totalorder %s17_s13, %s236_s21  ;;  %p242_p5 = scmp.lt.s32.totalorder %s236_s21, %s236_s21 }
   0xa   :  { %p243_p6 = por %p242_p5, %p241_p4 }
   0xc   :  { %p244_p7 = pnand %p243_p6, %p237_p3 }
   0xe   :  { %247 = shalt.err (!%p244_p7)
}
   0xf   :  { %s251_s22 = smov 64   ;;  %s252_s23 = smov 4  }
  0x10   :  { %22 = dma.hbm_to_vmem [thread:$0]  %s300_s1, 1024, %s17_s13, [#allocation4], %s251_s22, %s251_s22, %s252_s23  }
  0x11   :  { %248 = dma.done.wait [#allocation4], 1024  }
  0x12   :  { %249 = vsyncadd [#allocation4], 4294966272  ;;  %v253_v0 = vmov 0.0   ;;  %vm254_vm0 = vmmov 0   ;;  %v217_v1 = vld [vmem:[#allocation3] sm:$0xff]   ;;  %v218_v2 = vld [vmem:[#allocation3 + $0x8] sm:$0xff]  }
  0x13   :  { %192 = vmatprep.subr.bf16.mxu0 %v253_v0  ;;  %208 = vmatprep.mubr.msk.bf16.mxu0 %vm254_vm0, %v253_v0  ;;  %v219_v3 = vld [vmem:[#allocation3 + $0x10] sm:$0xff]   ;;  %v220_v4 = vld [vmem:[#allocation3 + $0x18] sm:$0xff]   ;;  %v221_v5 = vld [vmem:[#allocation3 + $0x20] sm:$0xff]  }
  0x14   :  { %193 = vmatpush3.bf16.xpose.msra.mxu0 %v217_v1  ;;  %v222_v6 = vld [vmem:[#allocation3 + $0x28] sm:$0xff]   ;;  %v223_v7 = vld [vmem:[#allocation3 + $0x30] sm:$0xff]   ;;  %v224_v8 = vld [vmem:[#allocation3 + $0x38] sm:$0xff]  }
  0x15   :  { %194 = vmatprep.subr.bf16.mxu0 %v253_v0  ;;  %v225_v9 = vld [vmem:[%s299_s0] sm:$0xff]  }
  0x16   :  { %v173_v10 = vld [vmem:[%s301_s2] ss:$0 sm:$0xff] }
  0x1c   :  { %195 = vmatpush3.bf16.xpose.msra.mxu0 %v218_v2 }
  0x1d   :  { %196 = vmatprep.subr.bf16.mxu0 %v253_v0 }
  0x24   :  { %197 = vmatpush3.bf16.xpose.msra.mxu0 %v219_v3 }
  0x25   :  { %198 = vmatprep.subr.bf16.mxu0 %v253_v0 }
  0x2c   :  { %199 = vmatpush3.bf16.xpose.msra.mxu0 %v220_v4 }
  0x2d   :  { %200 = vmatprep.subr.bf16.mxu0 %v253_v0 }
  0x34   :  { %201 = vmatpush3.bf16.xpose.msra.mxu0 %v221_v5 }
  0x35   :  { %202 = vmatprep.subr.bf16.mxu0 %v253_v0 }
  0x3c   :  { %203 = vmatpush3.bf16.xpose.msra.mxu0 %v222_v6 }
  0x3d   :  { %204 = vmatprep.subr.bf16.mxu0 %v253_v0 }
  0x44   :  { %205 = vmatpush3.bf16.xpose.msra.mxu0 %v223_v7 }
  0x45   :  { %206 = vmatprep.subr.bf16.mxu0 %v253_v0 }
  0x4c   :  { %207 = vmatpush3.bf16.xpose.msra.mxu0 %v224_v8 }
  0x53   :  { %209 = vmatmul.mubr.bf16.vlgmr.msra.gmra.mrb[0].mxu0 %v225_v9 }
 0x126   :  { %v150_v11 = vpop.f32.mrb[0].mxu0 }
 0x127   :  { %v157_v12 = vadd.f32 %v173_v10, %v150_v11  ;;  %v210_v13 = vpop.f32.mrb[1].mxu0 }
 0x128   :  { %v153_v14 = vpop.f32.mrb[2].mxu0 }
 0x129   :  { %166 = vst [vmem:[%s302_s3] sm:$0xff] %v157_v12  ;;  %v158_v15 = vadd.f32 %v173_v10, %v153_v14  ;;  %v211_v16 = vpop.f32.mrb[3].mxu0 }
 0x12b   :  { %167 = vst [vmem:[%s302_s3 + $0x8] sm:$0xff] %v158_v15 }
 0x12c   :  { %172 = vsyncpa [#allocation4], 1 }

</bundles_post_ra>
